<compile_context>
chip_gen: v7x
topology: tpu7x:2x2x1
jax: 0.10.0
libtpu: 0.0.40
codegen_flags: <defaults>
</compile_context>

<pallas_src>
import jax
import jax.numpy as jnp
from jax import lax
from jax.experimental import pallas as pl
from jax.experimental.pallas import tpu as pltpu


def _moments_kernel(coords_ref, bidx_ref, cov_ref, cnt_ref):
    """Single-shot kernel: per-batch mean + covariance for ALL batches at once.

    coords_ref: (D, N) f32 -- hit coordinates, hits on the lane axis.
    bidx_ref:   (1, N) i32 -- batch id per hit.
    cov_ref:    (B, D*D) f32 -- row-major packed per-batch covariance.
    cnt_ref:    (B, 1) f32 -- hits per batch (used to mask absent batches).
    """
    D = coords_ref.shape[0]
    N = coords_ref.shape[1]
    B = cnt_ref.shape[0]

    coords = coords_ref[...]                                   # (D, N)
    bidx = bidx_ref[...]                                       # (1, N)

    # One-hot batch membership mask for all batches in one sweep.
    batch_ids = lax.broadcasted_iota(jnp.int32, (B, N), 0)     # (B, N)
    mask = (batch_ids == bidx).astype(jnp.float32)             # (B, N)

    cnt = jnp.sum(mask, axis=-1, keepdims=True)                # (B, 1)
    cnt_safe = jnp.maximum(cnt, 1.0)                           # guard empty batches
    inv_n = 1.0 / cnt_safe                                     # (B, 1)

    # Per-batch mean (two-pass form: avoids E[xx]-mu*mu cancellation).
    sums = jnp.sum(mask[:, None, :] * coords[None, :, :], axis=-1)   # (B, D)
    mean = sums * inv_n                                               # (B, D)

    # Centered, masked coords per batch: (B, D, N)
    xc = (coords[None, :, :] - mean[:, :, None]) * mask[:, None, :]

    # Covariance rows: VPU multiplies + lane reductions (no MXU for a 4x4 output).
    for i in range(D):                                         # static unroll, D tiny
        xi = xc[:, i:i + 1, :]                                 # (B, 1, N)
        row = jnp.sum(xc * xi, axis=-1) * inv_n                # (B, D) = cov[:, i, :]
        cov_ref[:, i * D:(i + 1) * D] = row                    # packed lane slice

    cnt_ref[...] = cnt


def per_batch_moments(coords, batch_idx, num_batches):
    """Returns (cov: (B, D, D) f32, cnt: (B,) f32) computed in one Pallas call."""
    N, D = coords.shape
    coords_t = coords.astype(jnp.float32).T                    # (D, N): hits lane-dense
    bidx = batch_idx.astype(jnp.int32).reshape(1, N)           # (1, N)

    cov_flat, cnt = pl.pallas_call(
        _moments_kernel,
        out_shape=(
            jax.ShapeDtypeStruct((num_batches, D * D), jnp.float32),
            jax.ShapeDtypeStruct((num_batches, 1), jnp.float32),
        ),
        grid_spec=pltpu.PrefetchScalarGridSpec(
            num_scalar_prefetch=0,
            grid=(1,),                                         # single sweep over all hits
            in_specs=[
                pl.BlockSpec((D, N), lambda i: (0, 0)),        # coords (D, N)
                pl.BlockSpec((1, N), lambda i: (0, 0)),        # batch ids (1, N)
            ],
            out_specs=(
                pl.BlockSpec((num_batches, D * D), lambda i: (0, 0)),
                pl.BlockSpec((num_batches, 1), lambda i: (0, 0)),
            ),
        ),
        compiler_params=pltpu.CompilerParams(
            dimension_semantics=("arbitrary",),
        ),
    )(coords_t, bidx)

    return cov_flat.reshape(num_batches, D, D), cnt[:, 0]


def ll_fill_space_loss(coords, batch_idx, num_batches, maxhits=1000):
    """Equivalent of LLFillSpace(maxhits=1000, runevery=-1).forward(coords, batch_idx)."""
    # TODO(synk): random subsampling via torch.randint when nhits > maxhits is not
    # reproduced; at these shapes nhits <= maxhits so selection is the identity
    # (matching the torch.arange branch exactly).
    cov, cnt = per_batch_moments(coords, batch_idx, num_batches)   # (B, D, D), (B,)

    # cov is symmetric, so torch.linalg.eig's eigenvalues are real; eigvalsh matches
    # the real parts that torch casts to float32.
    # TODO(synk): a fused in-kernel 4x4 symmetric eigen-solve (Jacobi/closed-form)
    # would remove these extra HLO kernels; kept in XLA for exactness.
    eig = jnp.linalg.eigvalsh(cov)                              # (B, D) f32
    mean_e = jnp.mean(eig, axis=-1)
    min_e = jnp.min(eig, axis=-1)
    pen = jnp.log((mean_e / (min_e + 1e-6) - 1.0) ** 2 + 1.0)   # per-batch penalty

    # Reference loops over batch_idx.unique(): batches with zero hits contribute 0.
    pen = jnp.where(cnt > 0.0, pen, 0.0)
    return jnp.sum(pen)


def _loss_ref(coords, batch_idx, num_batches):
    """Pure-JAX reference (mirrors the torch module) for a correctness check."""
    coords = coords.astype(jnp.float32)
    total = jnp.float32(0.0)
    for b in range(num_batches):
        m = (batch_idx == b)
        n = jnp.sum(m.astype(jnp.float32))
        n_safe = jnp.maximum(n, 1.0)
        w = m.astype(jnp.float32)[:, None]
        mean = jnp.sum(coords * w, axis=0) / n_safe
        xc = (coords - mean) * w
        cov = (xc.T @ xc) / n_safe
        eig = jnp.linalg.eigvalsh(cov)
        pen = jnp.log((jnp.mean(eig) / (jnp.min(eig) + 1e-6) - 1.0) ** 2 + 1.0)
        total = total + jnp.where(n > 0, pen, 0.0)
    return total


if __name__ == "__main__":
    key = jax.random.PRNGKey(0)
    k1, k2 = jax.random.split(key)

    N, D, B = 256, 4, 2   # hits, clustering-space dims, batches (N <= maxhits)
    coords = jax.random.normal(k1, (N, D), dtype=jnp.float32)
    # two batches of hits, interleaved assignment
    batch_idx = (jax.random.uniform(k2, (N,)) > 0.5).astype(jnp.int32)

    loss = ll_fill_space_loss(coords, batch_idx, num_batches=B, maxhits=1000)
    jax.block_until_ready(loss)

    ref = _loss_ref(coords, batch_idx, B)
    assert bool(jnp.isfinite(loss)), "loss is not finite"
    assert abs(float(loss) - float(ref)) < 1e-3, (float(loss), float(ref))
    print("KERNEL_OK")
</pallas_src>

<mosaic_0001>
module attributes {stable_mosaic.version = 11 : i64} {
  func.func @_moments_kernel(%arg0: i32, %arg1: memref<4x256xf32, #tpu.memory_space<vmem>>, %arg2: memref<1x256xi32, #tpu.memory_space<vmem>>, %arg3: memref<2x16xf32, #tpu.memory_space<vmem>>, %arg4: memref<2x1xf32, #tpu.memory_space<vmem>>) attributes {dimension_semantics = [#tpu.dimension_semantics<arbitrary>], iteration_bounds = array<i64: 1>, scalar_prefetch = 0 : i64, scratch_operands = 0 : i64, tpu.core_type = #tpu.core_type<tc>, window_params = [{pipeline_mode = #tpu.pipeline_mode<synchronous>, transform_indices = @transform_0, window_bounds = array<i64: 4, 256>}, {pipeline_mode = #tpu.pipeline_mode<synchronous>, transform_indices = @transform_1, window_bounds = array<i64: 1, 256>}, {pipeline_mode = #tpu.pipeline_mode<synchronous>, transform_indices = @transform_2, window_bounds = array<i64: 2, 16>}, {pipeline_mode = #tpu.pipeline_mode<synchronous>, transform_indices = @transform_3, window_bounds = array<i64: 2, 1>}]} {
    %c0 = arith.constant 0 : index
    %c0_0 = arith.constant 0 : index
    %0 = vector.load %arg1[%c0, %c0_0] : memref<4x256xf32, #tpu.memory_space<vmem>>, vector<4x256xf32>
    %c0_1 = arith.constant 0 : index
    %c0_2 = arith.constant 0 : index
    %1 = vector.load %arg2[%c0_1, %c0_2] : memref<1x256xi32, #tpu.memory_space<vmem>>, vector<1x256xi32>
    %2 = tpu.iota {dimensions = array<i32: 0>} : vector<2x256xi32>
    %3 = vector.broadcast %1 : vector<1x256xi32> to vector<2x256xi32>
    %4 = arith.cmpi eq, %2, %3 : vector<2x256xi32>
    %5 = arith.extui %4 : vector<2x256xi1> to vector<2x256xi32>
    %6 = arith.sitofp %5 : vector<2x256xi32> to vector<2x256xf32>
    %cst = arith.constant dense<0.000000e+00> : vector<2xf32>
    %7 = vector.multi_reduction <add>, %6, %cst [1] : vector<2x256xf32> to vector<2xf32>
    %8 = vector.shape_cast %7 : vector<2xf32> to vector<2x1xf32>
    %cst_3 = arith.constant 1.000000e+00 : f32
    %9 = vector.broadcast %cst_3 : f32 to vector<2x1xf32>
    %10 = arith.maximumf %8, %9 : vector<2x1xf32>
    %cst_4 = arith.constant 1.000000e+00 : f32
    %11 = vector.broadcast %cst_4 : f32 to vector<2x1xf32>
    %12 = arith.divf %11, %10 : vector<2x1xf32>
    %13 = vector.shape_cast %6 : vector<2x256xf32> to vector<2x1x256xf32>
    %14 = vector.shape_cast %0 : vector<4x256xf32> to vector<1x4x256xf32>
    %15 = vector.broadcast %13 : vector<2x1x256xf32> to vector<2x4x256xf32>
    %16 = vector.broadcast %14 : vector<1x4x256xf32> to vector<2x4x256xf32>
    %17 = arith.mulf %15, %16 : vector<2x4x256xf32>
    %cst_5 = arith.constant dense<0.000000e+00> : vector<2x4xf32>
    %18 = vector.multi_reduction <add>, %17, %cst_5 [2] : vector<2x4x256xf32> to vector<2x4xf32>
    %19 = vector.broadcast %12 : vector<2x1xf32> to vector<2x4xf32>
    %20 = arith.mulf %18, %19 : vector<2x4xf32>
    %21 = vector.shape_cast %0 : vector<4x256xf32> to vector<1x4x256xf32>
    %22 = vector.shape_cast %20 : vector<2x4xf32> to vector<2x4x1xf32>
    %23 = vector.broadcast %21 : vector<1x4x256xf32> to vector<2x4x256xf32>
    %24 = vector.broadcast %22 : vector<2x4x1xf32> to vector<2x4x256xf32>
    %25 = arith.subf %23, %24 : vector<2x4x256xf32>
    %26 = vector.shape_cast %6 : vector<2x256xf32> to vector<2x1x256xf32>
    %27 = vector.broadcast %26 : vector<2x1x256xf32> to vector<2x4x256xf32>
    %28 = arith.mulf %25, %27 : vector<2x4x256xf32>
    %29 = vector.extract_strided_slice %28 {offsets = [0, 0, 0], sizes = [2, 1, 256], strides = [1, 1, 1]} : vector<2x4x256xf32> to vector<2x1x256xf32>
    %30 = vector.broadcast %29 : vector<2x1x256xf32> to vector<2x4x256xf32>
    %31 = arith.mulf %28, %30 : vector<2x4x256xf32>
    %cst_6 = arith.constant dense<0.000000e+00> : vector<2x4xf32>
    %32 = vector.multi_reduction <add>, %31, %cst_6 [2] : vector<2x4x256xf32> to vector<2x4xf32>
    %33 = vector.broadcast %12 : vector<2x1xf32> to vector<2x4xf32>
    %34 = arith.mulf %32, %33 : vector<2x4xf32>
    %c0_7 = arith.constant 0 : index
    %c0_8 = arith.constant 0 : index
    %35 = vector.load %arg3[%c0_7, %c0_8] : memref<2x16xf32, #tpu.memory_space<vmem>>, vector<2x4xf32>
    tpu.vector_store %arg3[%c0_7, %c0_8], %34 {strides = array<i32>} : memref<2x16xf32, #tpu.memory_space<vmem>>, vector<2x4xf32>,
    %36 = vector.extract_strided_slice %28 {offsets = [0, 1, 0], sizes = [2, 1, 256], strides = [1, 1, 1]} : vector<2x4x256xf32> to vector<2x1x256xf32>
    %37 = vector.broadcast %36 : vector<2x1x256xf32> to vector<2x4x256xf32>
    %38 = arith.mulf %28, %37 : vector<2x4x256xf32>
    %cst_9 = arith.constant dense<0.000000e+00> : vector<2x4xf32>
    %39 = vector.multi_reduction <add>, %38, %cst_9 [2] : vector<2x4x256xf32> to vector<2x4xf32>
    %40 = vector.broadcast %12 : vector<2x1xf32> to vector<2x4xf32>
    %41 = arith.mulf %39, %40 : vector<2x4xf32>
    %c0_10 = arith.constant 0 : index
    %c4 = arith.constant 4 : index
    %42 = vector.load %arg3[%c0_10, %c4] : memref<2x16xf32, #tpu.memory_space<vmem>>, vector<2x4xf32>
    tpu.vector_store %arg3[%c0_10, %c4], %41 {strides = array<i32>} : memref<2x16xf32, #tpu.memory_space<vmem>>, vector<2x4xf32>,
    %43 = vector.extract_strided_slice %28 {offsets = [0, 2, 0], sizes = [2, 1, 256], strides = [1, 1, 1]} : vector<2x4x256xf32> to vector<2x1x256xf32>
    %44 = vector.broadcast %43 : vector<2x1x256xf32> to vector<2x4x256xf32>
    %45 = arith.mulf %28, %44 : vector<2x4x256xf32>
    %cst_11 = arith.constant dense<0.000000e+00> : vector<2x4xf32>
    %46 = vector.multi_reduction <add>, %45, %cst_11 [2] : vector<2x4x256xf32> to vector<2x4xf32>
    %47 = vector.broadcast %12 : vector<2x1xf32> to vector<2x4xf32>
    %48 = arith.mulf %46, %47 : vector<2x4xf32>
    %c0_12 = arith.constant 0 : index
    %c8 = arith.constant 8 : index
    %49 = vector.load %arg3[%c0_12, %c8] : memref<2x16xf32, #tpu.memory_space<vmem>>, vector<2x4xf32>
    tpu.vector_store %arg3[%c0_12, %c8], %48 {strides = array<i32>} : memref<2x16xf32, #tpu.memory_space<vmem>>, vector<2x4xf32>,
    %50 = vector.extract_strided_slice %28 {offsets = [0, 3, 0], sizes = [2, 1, 256], strides = [1, 1, 1]} : vector<2x4x256xf32> to vector<2x1x256xf32>
    %51 = vector.broadcast %50 : vector<2x1x256xf32> to vector<2x4x256xf32>
    %52 = arith.mulf %28, %51 : vector<2x4x256xf32>
    %cst_13 = arith.constant dense<0.000000e+00> : vector<2x4xf32>
    %53 = vector.multi_reduction <add>, %52, %cst_13 [2] : vector<2x4x256xf32> to vector<2x4xf32>
    %54 = vector.broadcast %12 : vector<2x1xf32> to vector<2x4xf32>
    %55 = arith.mulf %53, %54 : vector<2x4xf32>
    %c0_14 = arith.constant 0 : index
    %c12 = arith.constant 12 : index
    %56 = vector.load %arg3[%c0_14, %c12] : memref<2x16xf32, #tpu.memory_space<vmem>>, vector<2x4xf32>
    tpu.vector_store %arg3[%c0_14, %c12], %55 {strides = array<i32>} : memref<2x16xf32, #tpu.memory_space<vmem>>, vector<2x4xf32>,
    %c0_15 = arith.constant 0 : index
    %c0_16 = arith.constant 0 : index
    %57 = vector.load %arg4[%c0_15, %c0_16] : memref<2x1xf32, #tpu.memory_space<vmem>>, vector<2x1xf32>
    tpu.vector_store %arg4[%c0_15, %c0_16], %8 {strides = array<i32>} : memref<2x1xf32, #tpu.memory_space<vmem>>, vector<2x1xf32>,
    return
  }
  func.func @transform_0(%arg0: i32) -> (i32, i32) {
    %c0_i32 = arith.constant 0 : i32
    %c0_i32_0 = arith.constant 0 : i32
    %c0_i32_1 = arith.constant 0 : i32
    return %c0_i32, %c0_i32_0 : i32, i32
  }
  func.func @transform_1(%arg0: i32) -> (i32, i32) {
    %c0_i32 = arith.constant 0 : i32
    %c0_i32_0 = arith.constant 0 : i32
    %c0_i32_1 = arith.constant 0 : i32
    return %c0_i32, %c0_i32_0 : i32, i32
  }
  func.func @transform_2(%arg0: i32) -> (i32, i32) {
    %c0_i32 = arith.constant 0 : i32
    %c0_i32_0 = arith.constant 0 : i32
    %c0_i32_1 = arith.constant 0 : i32
    return %c0_i32, %c0_i32_0 : i32, i32
  }
  func.func @transform_3(%arg0: i32) -> (i32, i32) {
    %c0_i32 = arith.constant 0 : i32
    %c0_i32_0 = arith.constant 0 : i32
    %c0_i32_1 = arith.constant 0 : i32
    return %c0_i32, %c0_i32_0 : i32, i32
  }
}

</mosaic_0001>

<bundles_post_ra>
// kernel: tpu_custom_call.1
= control target key start
LH: loop header
LB: loop body
LE: loop exit
PB: predicated region body
PF: predicated region fallthrough
CT: control target
= control target key end

     0   :  { %9 = vsyncpa [#allocation3], 0  ;;  %s753_s0 = inlined_call_operand.hbm [shape: f32[4,256], index: 0, kind: input, shape index: {}]   ;;  %s754_s1 = inlined_call_operand.vmem [shape: s32[1,256], index: 1, kind: input, shape index: {}]   ;;  %s755_s2 = inlined_call_operand.hbm [shape: f32[2,16], index: 2, kind: output, shape index: {0}]   ;;  %s756_s3 = inlined_call_operand.vmem [shape: f32[2,1], index: 3, kind: output, shape index: {1}]  }
   0x1   :  { %10 = vsyncpa [#allocation4], 0  ;;  %s587_s12 = smov [#allocation2]   ;;  %s539_s16 = scalar_lea.hbm %s753_s0, 128 }
   0x2   :  { %s17_s13 = sshll.u32 %s587_s12, 4  ;;  %p540_p0 = scmp.ne.s32.totalorder %s753_s0, %s539_s16  ;;  %s18_s13 = int_to_ptr.vmem [resolvable:$true] %s17_s13 }
   0x3   :  { %p543_p1 = scmp.lt.u32.totalorder %s539_s16, %s753_s0 }
   0x5   :  { %p545_p2 = pnand %p543_p1, %p540_p0 }
   0x7   :  { %548 = shalt.err (!%p545_p2)
}
   0x8   :  { %s549_s21 = scalar_lea.vmem %s18_s13, 128  ;;  %p554_p4 = scmp.lt.s32.totalorder %s18_s13, %s18_s13 }
   0x9   :  { %p550_p3 = scmp.ne.s32.totalorder %s18_s13, %s549_s21  ;;  %p555_p5 = scmp.lt.s32.totalorder %s549_s21, %s549_s21 }
   0xb   :  { %p556_p6 = por %p555_p5, %p554_p4 }
   0xd   :  { %p557_p7 = pnand %p556_p6, %p550_p3 }
   0xf   :  { %560 = shalt.err (!%p557_p7)
}
  0x10   :  { %20 = dma.hbm_to_vmem [thread:$0]  %s753_s0, 128, %s18_s13, [#allocation3]  }
  0x11   :  { %583 = dma.done.wait [#allocation3], 128  }
  0x12   :  { %584 = vsyncadd [#allocation3], 4294967168  ;;  %v28_v0 = vlaneseq  ;;  %v588_v2 = vmov 1966171168   ;;  %v27_v7 = vld [vmem:[%s754_s1] sm:$0x3] }
  0x13   :  { %v57_v3 = vunpack.c.l.s4 %v588_v2  ;;  %vm44_vm0 = vcmask 1041408   ;;  %v589_v11 = vmov 0.0   ;;  %v26_v18 = vld [vmem:[#allocation2] sm:$0xff]  ;;  %vm105_vm3 = vcmask 1043456  }
  0x14   :  { %v626_v1 = vshrl.u32 %v28_v0, 7  ;;  %v99_v22 = vcombine.high %v26_v18, %v26_v18  ;;  %v590_v38 = vmov 0   ;;  %vm505_vm4 = vcmask 1024  }
  0x15   :  { %v58_v6 = vunpack.c.0.s8 %v57_v3  ;;  %535 = vset.pattern.permute.xlu0 %v590_v38  ;;  %534 = vset.pattern.permute.xlu1 %v590_v38  ;;  %v591_v49 = vmov 839922192   ;;  %vm245_vm5 = vcmask 1041409   ;;  %vm248_vm6 = vcmask 25600  }
  0x16   :  { %v629_v4 = vsub.s32 0, %v626_v1  ;;  %v632_v5 = vsub.s32 1, %v626_v1  ;;  %v138_v50 = vunpack.c.l.s4 %v591_v49  ;;  %v169_v60 = vsub.s32 4, %v626_v1 }
  0x17   :  { %v61_v10 = vsub.s32 %v58_v6, %v626_v1  ;;  %v256_v61 = vsub.s32 5, %v626_v1  ;;  %v337_v2 = vsub.s32 2, %v626_v1  ;;  %v341_v3 = vsub.s32 6, %v626_v1 }
  0x18   :  { %v33_v8 = vrot.slane %v27_v7, %v629_v4  ;;  %v37_v9 = vrot.slane %v27_v7, %v632_v5  ;;  %v139_v51 = vunpack.c.0.s8 %v138_v50  ;;  %v422_v38 = vsub.s32 3, %v626_v1 }
  0x19   :  { %vm333_vm7 = vcmask 58400   ;;  %vm418_vm8 = vcmask 91200   ;;  %vm503_vm9 = vcmask 124000  }
  0x1a   :  { %vm38_vm1 = vcmp.eq.s32.totalorder %v626_v1, %v33_v8  ;;  %vm39_vm2 = vcmp.eq.s32.totalorder %v626_v1, %v37_v9  ;;  %v142_v52 = vsub.s32 %v139_v51, %v626_v1 }
  0x1b   :  { %v526_v12 = vsel %vm38_vm1, 1.0, %v589_v11  ;;  %v527_v13 = vsel %vm39_vm2, 1.0, %v589_v11 }
  0x1c   :  { %v45_v14 = vsel %vm44_vm0, %v526_v12, 0.0  ;;  %v46_v15 = vsel %vm44_vm0, %v527_v13, 0.0  ;;  %v55_v16 = vcombine.low %v526_v12, %v527_v13 }
  0x1d   :  { %v47_v17 = vadd.f32 %v46_v15, %v45_v14 }
  0x1e   :  { %v62_v19 = vrot.slane %v55_v16, %v61_v10 }
  0x1f   :  { %48 = vadd.xlane.f32.xlu0 %v47_v17 }
  0x20   :  { %v63_v20 = vcombine.high %v62_v19, %v62_v19  ;;  %v70_v21 = vrot.slane %v62_v19, %v61_v10 }
  0x22   :  { %v77_v23 = vrot.slane %v63_v20, %v61_v10  ;;  %v81_v24 = vrot.slane %v70_v21, %v629_v4  ;;  %v85_v25 = vrot.slane %v70_v21, %v632_v5 }
  0x24   :  { %v89_v26 = vrot.slane %v77_v23, %v629_v4  ;;  %v93_v27 = vrot.slane %v77_v23, %v632_v5  ;;  %v101_v28 = vmul.f32 %v81_v24, %v26_v18  ;;  %v102_v29 = vmul.f32 %v99_v22, %v85_v25 }
  0x25   :  { %v155_v39 = vcombine.low %v81_v24, %v85_v25 }
  0x26   :  { %v103_v30 = vmul.f32 %v89_v26, %v26_v18  ;;  %v104_v31 = vmul.f32 %v99_v22, %v93_v27  ;;  %v106_v32 = vsel %vm105_vm3, %v101_v28, 0.0  ;;  %v107_v33 = vsel %vm105_vm3, %v102_v29, 0.0 }
  0x27   :  { %v108_v34 = vadd.f32 %v107_v33, %v106_v32  ;;  %v156_v56 = vcombine.low %v89_v26, %v93_v27 }
  0x28   :  { %v111_v35 = vsel %vm105_vm3, %v103_v30, 0.0  ;;  %v112_v36 = vsel %vm105_vm3, %v104_v31, 0.0 }
  0x29   :  { %v113_v37 = vadd.f32 %v112_v36, %v111_v35  ;;  %109 = vadd.xlane.f32.xlu0 %v108_v34 }
  0x2b   :  { %114 = vadd.xlane.f32.xlu1 %v113_v37 }
  0xac   :  { %v49_v40 = vpop.xlane.xlu0 %48 }
  0xad   :  { %v50_v41 = vmax.f32 %v49_v40, 1.0  ;;  %506 = vst.msk [vmem:[%s756_s3] sm:$0x3] %vm505_vm4, %v49_v40  ;;  %s592_s3 = smov [#allocation5]  }
  0xae   :  { %s513_s26 = sshll.u32 %s592_s3, 4  ;;  %s514_s26 = int_to_ptr.vmem [resolvable:$true] %s513_s26 }
  0xaf   :  { %537 = vrcp.f32 %v50_v41  ;;  %s561_s27 = scalar_lea.vmem %s514_s26, 32  ;;  %p566_p9 = scmp.lt.s32.totalorder %s514_s26, %s514_s26 }
  0xb0   :  { %p562_p8 = scmp.ne.s32.totalorder %s514_s26, %s561_s27  ;;  %p567_p10 = scmp.lt.s32.totalorder %s561_s27, %s561_s27 }
  0xb2   :  { %p568_p11 = por %p567_p10, %p566_p9 }
  0xb4   :  { %p569_p12 = pnand %p568_p11, %p562_p8 }
  0xb6   :  { %v110_v44 = vpop.xlane.xlu0 %109 }
  0xb8   :  { %v115_v43 = vpop.xlane.xlu1 %114 }
  0xb9   :  { %v538_v42 = vpop.eup %537 }
  0xba   :  { %v654_v45 = vrot.slane %v538_v42, %v632_v5  ;;  %v657_v46 = vrot.slane %v538_v42, %v629_v4 }
  0xbc   :  { %v128_v47 = vmul.f32 %v654_v45, %v115_v43  ;;  %v127_v48 = vmul.f32 %v657_v46, %v110_v44 }
  0xbe   :  { %135 = vperm.xlu0 %535, %v128_v47   ;;  %131 = vperm.xlu1 %534, %v127_v48  }
 0x13d   :  { %v132_v53 = vpop.permute.xlu1 %131  ;;  %v136_v54 = vpop.permute.xlu0 %135 }
 0x13e   :  { %v143_v55 = vrot.slane %v132_v53, %v142_v52  ;;  %v150_v57 = vrot.slane %v136_v54, %v142_v52 }
 0x140   :  { %v153_v58 = vsub.f32 %v26_v18, %v143_v55  ;;  %v154_v59 = vsub.f32 %v26_v18, %v150_v57 }
 0x142   :  { %v664_v62 = vmul.f32 %v155_v39, %v153_v58  ;;  %v666_v63 = vmul.f32 %v156_v56, %v154_v59  ;;  %v426_v39 = vsub.s32 7, %v626_v1 }
 0x144   :  { %v166_v6 = vrot.slane %v664_v62, %v629_v4  ;;  %v170_v7 = vrot.slane %v664_v62, %v169_v60  ;;  %v174_v8 = vrot.slane %v666_v63, %v629_v4  ;;  %v178_v9 = vrot.slane %v666_v63, %v169_v60 }
 0x145   :  { %v253_v10 = vrot.slane %v664_v62, %v632_v5  ;;  %v257_v11 = vrot.slane %v664_v62, %v256_v61  ;;  %v261_v12 = vrot.slane %v666_v63, %v632_v5  ;;  %v265_v13 = vrot.slane %v666_v63, %v256_v61 }
 0x146   :  { %v186_v14 = vrot.slane %v166_v6, %v629_v4  ;;  %v190_v15 = vrot.slane %v170_v7, %v629_v4  ;;  %v194_v16 = vrot.slane %v174_v8, %v629_v4  ;;  %v198_v17 = vrot.slane %v178_v9, %v629_v4 }
 0x147   :  { %v273_v18 = vrot.slane %v253_v10, %v632_v5  ;;  %v277_v19 = vrot.slane %v257_v11, %v632_v5  ;;  %v281_v20 = vrot.slane %v261_v12, %v632_v5  ;;  %v285_v21 = vrot.slane %v265_v13, %v632_v5 }
 0x148   :  { %v203_v22 = vcombine.low %v186_v14, %v190_v15  ;;  %v204_v23 = vcombine.low %v194_v16, %v198_v17  ;;  %v338_v24 = vrot.slane %v664_v62, %v337_v2  ;;  %v342_v25 = vrot.slane %v664_v62, %v341_v3 }
 0x149   :  { %v290_v26 = vcombine.low %v273_v18, %v277_v19  ;;  %v291_v27 = vcombine.low %v281_v20, %v285_v21  ;;  %v346_v28 = vrot.slane %v666_v63, %v337_v2  ;;  %v350_v4 = vrot.slane %v666_v63, %v341_v3 }
 0x14a   :  { %v207_v29 = vmul.f32 %v203_v22, %v664_v62  ;;  %v208_v30 = vmul.f32 %v204_v23, %v666_v63  ;;  %v358_v31 = vrot.slane %v338_v24, %v337_v2  ;;  %v362_v32 = vrot.slane %v342_v25, %v337_v2 }
 0x14b   :  { %v294_v5 = vmul.f32 %v290_v26, %v664_v62  ;;  %v295_v33 = vmul.f32 %v291_v27, %v666_v63  ;;  %v366_v34 = vrot.slane %v346_v28, %v337_v2  ;;  %v370_v35 = vrot.slane %v350_v4, %v337_v2 }
 0x14c   :  { %v211_v36 = vcombine.high %v207_v29, %v207_v29  ;;  %v212_v37 = vcombine.high %v208_v30, %v208_v30  ;;  %v215_v40 = vsel %vm105_vm3, %v207_v29, 0.0  ;;  %v220_v41 = vsel %vm105_vm3, %v208_v30, 0.0 }
 0x14d   :  { %v298_v42 = vcombine.high %v294_v5, %v294_v5  ;;  %v299_v43 = vcombine.high %v295_v33, %v295_v33  ;;  %v375_v48 = vcombine.low %v358_v31, %v362_v32  ;;  %v376_v49 = vcombine.low %v366_v34, %v370_v35 }
 0x14e   :  { %v216_v44 = vsel %vm105_vm3, %v211_v36, 0.0  ;;  %v221_v47 = vsel %vm105_vm3, %v212_v37, 0.0  ;;  %v302_v56 = vsel %vm105_vm3, %v294_v5, 0.0  ;;  %v423_v57 = vrot.slane %v664_v62, %v422_v38 }
 0x14f   :  { %v217_v50 = vadd.f32 %v216_v44, %v215_v40  ;;  %v222_v51 = vadd.f32 %v221_v47, %v220_v41  ;;  %v303_v52 = vsel %vm105_vm3, %v298_v42, 0.0  ;;  %v308_v53 = vsel %vm105_vm3, %v299_v43, 0.0 }
 0x150   :  { %v379_v54 = vmul.f32 %v375_v48, %v664_v62  ;;  %v380_v55 = vmul.f32 %v376_v49, %v666_v63  ;;  %v427_v58 = vrot.slane %v664_v62, %v426_v39  ;;  %v431_v59 = vrot.slane %v666_v63, %v422_v38 }
 0x151   :  { %218 = vadd.xlane.f32.xlu1 %v217_v50  ;;  %223 = vadd.xlane.f32.xlu0 %v222_v51  ;;  %v304_v60 = vadd.f32 %v303_v52, %v302_v56  ;;  %v307_v61 = vsel %vm105_vm3, %v295_v33, 0.0  ;;  %v443_v6 = vrot.slane %v423_v57, %v422_v38  ;;  %v435_v8 = vrot.slane %v666_v63, %v426_v39 }
 0x152   :  { %v383_v2 = vcombine.high %v379_v54, %v379_v54  ;;  %v309_v3 = vadd.f32 %v308_v53, %v307_v61  ;;  %v447_v7 = vrot.slane %v427_v58, %v422_v38  ;;  %v384_v10 = vcombine.high %v380_v55, %v380_v55 }
 0x153   :  { %v451_v11 = vrot.slane %v431_v59, %v422_v38  ;;  %v387_v13 = vsel %vm105_vm3, %v379_v54, 0.0  ;;  %v455_v14 = vrot.slane %v435_v8, %v422_v38  ;;  %v392_v20 = vsel %vm105_vm3, %v380_v55, 0.0 }
 0x154   :  { %v388_v9 = vsel %vm105_vm3, %v383_v2, 0.0  ;;  %v460_v12 = vcombine.low %v443_v6, %v447_v7  ;;  %v393_v17 = vsel %vm105_vm3, %v384_v10, 0.0  ;;  %v236_v42 = vand.u32 127, %v28_v0 }
 0x155   :  { %305 = vadd.xlane.f32.xlu1 %v304_v60  ;;  %310 = vadd.xlane.f32.xlu0 %v309_v3  ;;  %v389_v15 = vadd.f32 %v388_v9, %v387_v13  ;;  %v461_v18 = vcombine.low %v451_v11, %v455_v14  ;;  %v394_v22 = vadd.f32 %v393_v17, %v392_v20 }
 0x156   :  { %v464_v16 = vmul.f32 %v460_v12, %v664_v62  ;;  %v239_v43 = vsub.s32 %v236_v42, %v626_v1  ;;  %v322_v44 = vadd.s32 4294967292, %v236_v42  ;;  %v407_v0 = vadd.s32 4294967288, %v236_v42 }
 0x157   :  { %v465_v21 = vmul.f32 %v461_v18, %v666_v63  ;;  %v492_v61 = vadd.s32 4294967284, %v236_v42 }
 0x158   :  { %v468_v19 = vcombine.high %v464_v16, %v464_v16  ;;  %v472_v25 = vsel %vm105_vm3, %v464_v16, 0.0  ;;  %v325_v51 = vsub.s32 %v322_v44, %v626_v1  ;;  %v410_v56 = vsub.s32 %v407_v0, %v626_v1 }
 0x159   :  { %390 = vadd.xlane.f32.xlu0 %v389_v15  ;;  %v469_v24 = vcombine.high %v465_v21, %v465_v21  ;;  %v477_v62 = vsel %vm105_vm3, %v465_v21, 0.0  ;;  %v495_v3 = vsub.s32 %v492_v61, %v626_v1 }
 0x15a   :  { %v473_v23 = vsel %vm105_vm3, %v468_v19, 0.0 }
 0x15b   :  { %v474_v26 = vadd.f32 %v473_v23, %v472_v25  ;;  %v478_v27 = vsel %vm105_vm3, %v469_v24, 0.0 }
 0x15c   :  { %v479_v28 = vadd.f32 %v478_v27, %v477_v62 }
 0x15d   :  { %395 = vadd.xlane.f32.xlu0 %v394_v22 }
 0x161   :  { %475 = vadd.xlane.f32.xlu0 %v474_v26 }
 0x165   :  { %480 = vadd.xlane.f32.xlu0 %v479_v28 }
 0x1de   :  { %v219_v4 = vpop.xlane.xlu1 %218  ;;  %v224_v29 = vpop.xlane.xlu0 %223 }
 0x1df   :  { %v225_v30 = vmul.f32 %v219_v4, %v657_v46  ;;  %v226_v63 = vmul.f32 %v224_v29, %v654_v45 }
 0x1e1   :  { %230 = vperm.xlu1 %534, %v225_v30   ;;  %233 = vperm.xlu0 %535, %v226_v63  }
 0x1e2   :  { %v306_v31 = vpop.xlane.xlu1 %305  ;;  %v311_v32 = vpop.xlane.xlu0 %310 }
 0x1e3   :  { %v312_v5 = vmul.f32 %v306_v31, %v657_v46  ;;  %v313_v33 = vmul.f32 %v311_v32, %v654_v45 }
 0x1e5   :  { %317 = vperm.xlu1 %534, %v312_v5   ;;  %320 = vperm.xlu0 %535, %v313_v33  }
 0x1e6   :  { %v391_v34 = vpop.xlane.xlu0 %390 }
 0x1e7   :  { %v397_v35 = vmul.f32 %v391_v34, %v657_v46 }
 0x1e9   :  { %402 = vperm.xlu1 %534, %v397_v35  }
 0x1ea   :  { %v396_v36 = vpop.xlane.xlu0 %395 }
 0x1eb   :  { %v398_v37 = vmul.f32 %v396_v36, %v654_v45 }
 0x1ed   :  { %405 = vperm.xlu0 %535, %v398_v37  }
 0x1ee   :  { %v476_v38 = vpop.xlane.xlu0 %475 }
 0x1ef   :  { %v482_v39 = vmul.f32 %v476_v38, %v657_v46 }
 0x1f1   :  { %487 = vperm.xlu1 %534, %v482_v39  }
 0x1f2   :  { %v481_v40 = vpop.xlane.xlu0 %480 }
 0x1f3   :  { %v483_v41 = vmul.f32 %v481_v40, %v654_v45 }
 0x1f5   :  { %490 = vperm.xlu0 %535, %v483_v41  }
 0x260   :  { %v231_v47 = vpop.permute.xlu1 %230  ;;  %v234_v48 = vpop.permute.xlu0 %233 }
 0x261   :  { %v240_v49 = vrot.slane %v231_v47, %v239_v43  ;;  %v244_v50 = vrot.slane %v234_v48, %v239_v43 }
 0x263   :  { %v246_v46 = vsel %vm245_vm5, %v244_v50, %v240_v49 }
 0x264   :  { %249 = vst.msk [vmem:[#allocation5] sm:$0x3] %vm248_vm6, %v246_v46  ;;  %v318_v52 = vpop.permute.xlu1 %317  ;;  %v321_v53 = vpop.permute.xlu0 %320 }
 0x265   :  { %v326_v45 = vrot.slane %v318_v52, %v325_v51  ;;  %v330_v54 = vrot.slane %v321_v53, %v325_v51 }
 0x267   :  { %v331_v55 = vsel %vm245_vm5, %v330_v54, %v326_v45 }
 0x268   :  { %334 = vst.msk [vmem:[#allocation5] sm:$0x3] %vm333_vm7, %v331_v55  ;;  %v403_v57 = vpop.permute.xlu1 %402 }
 0x269   :  { %v411_v59 = vrot.slane %v403_v57, %v410_v56 }
 0x26c   :  { %v406_v58 = vpop.permute.xlu0 %405 }
 0x26d   :  { %v415_v60 = vrot.slane %v406_v58, %v410_v56 }
 0x26f   :  { %v416_v2 = vsel %vm245_vm5, %v415_v60, %v411_v59 }
 0x270   :  { %419 = vst.msk [vmem:[#allocation5] sm:$0x3] %vm418_vm8, %v416_v2  ;;  %v488_v6 = vpop.permute.xlu1 %487 }
 0x271   :  { %v496_v8 = vrot.slane %v488_v6, %v495_v3 }
 0x274   :  { %v491_v7 = vpop.permute.xlu0 %490 }
 0x275   :  { %v500_v9 = vrot.slane %v491_v7, %v495_v3 }
 0x277   :  { %v501_v10 = vsel %vm245_vm5, %v500_v9, %v496_v8 }
 0x278   :  { %504 = vst.msk [vmem:[#allocation5] sm:$0x3] %vm503_vm9, %v501_v10 }
 0x279   :  { %572 = shalt.err (!%p569_p12)
}
 0x27a   :  { %s573_s30 = scalar_lea.hbm %s755_s2, 32 }
 0x27b   :  { %p574_p13 = scmp.ne.s32.totalorder %s755_s2, %s573_s30  ;;  %p577_p0 = scmp.lt.u32.totalorder %s573_s30, %s755_s2 }
 0x27d   :  { %p579_p1 = pnand %p577_p0, %p574_p13 }
 0x27f   :  { %582 = shalt.err (!%p579_p1)
}
 0x280   :  { %516 = dma.vmem_to_hbm [thread:$0]  %s514_s26, 32, %s755_s2, [#allocation4]  }
 0x281   :  { %585 = dma.done.wait [#allocation4], 32  }
 0x282   :  { %586 = vsyncadd [#allocation4], 4294967264 }
 0x283   :  { %524 = vsyncpa [#allocation3], 1 }
 0x284   :  { %525 = vsyncpa [#allocation4], 1 }

</bundles_post_ra>
